<compile_context>
chip_gen: v5e
topology: v5e:2x2
jax: 0.10.0
libtpu: 0.0.40
codegen_flags: <defaults>
</compile_context>

<pallas_src>
import math

import jax
import jax.numpy as jnp
from jax import lax
from jax.experimental import pallas as pl
from jax.experimental.pallas import tpu as pltpu

# ---- model hyper-parameters (small, consistent with the module) ------------
B = 2            # batch
S = 8            # sequence length
H = 32           # hidden_dimension
NH = 4           # num_attention_heads
HD = H // NH     # head_dimension
FF = 64          # pointwise_ff_dim
BS = B * S       # flattened batch*sequence rows
LN_EPS = 1e-5    # PyTorch nn.LayerNorm default
NEG_INF = -1e15  # masked_fill value used by the module

assert S & (S - 1) == 0, "block-diagonal batch mask below uses a shift (S must be pow2)"
LOG2_S = S.bit_length() - 1


def _layer_norm(x, gamma, beta):
    mu = jnp.mean(x, axis=-1, keepdims=True)
    var = jnp.mean((x - mu) * (x - mu), axis=-1, keepdims=True)
    return (x - mu) * lax.rsqrt(var + LN_EPS) * gamma + beta


def encoder_block_kernel(xf_ref, mask_ref, wqkv_ref, wo_ref, w1_ref, w2_ref,
                         vec_ref, out_ref, qkv_s, ctx_s):
    xf = xf_ref[...]                                                  # (BS, H) f32

    # ---- fused Q/K/V projection: one (BS,H)@(H,3H) bf16 MXU contraction ----
    qkv_s[...] = (
        jnp.dot(xf.astype(jnp.bfloat16), wqkv_ref[...],
                preferred_element_type=jnp.float32)
        + vec_ref[0:1, 0:3 * H])                                      # (BS, 3H) f32

    # ---- head-major (NH, BS, HD) views via static lane-offset loads --------
    q = jnp.stack([qkv_s[:, pl.ds(h * HD, HD)] for h in range(NH)])
    k = jnp.stack([qkv_s[:, pl.ds(H + h * HD, HD)] for h in range(NH)])
    v = jnp.stack([qkv_s[:, pl.ds(2 * H + h * HD, HD)] for h in range(NH)])

    # ---- attention, all heads & batch elements batched together ------------
    # Queries/keys of both batch elements share the BS axis; cross-batch pairs
    # are removed by the additive block-diagonal bias (exp(-1e15-m) == 0.0
    # exactly), so the result equals per-batch attention.
    inv_scale = jnp.float32(1.0 / math.sqrt(HD))
    energy = jnp.einsum("hqd,hkd->hqk",
                        q.astype(jnp.bfloat16), k.astype(jnp.bfloat16),
                        preferred_element_type=jnp.float32) * inv_scale  # (NH,BS,BS)

    # additive mask bias, computed ONCE (key padding mask + batch block mask)
    key_bias = jnp.where(mask_ref[...] == 0.0,
                         jnp.float32(NEG_INF), jnp.float32(0.0))         # (1, BS)
    rb = lax.broadcasted_iota(jnp.int32, (BS, BS), 0) >> LOG2_S          # query batch id
    cb = lax.broadcasted_iota(jnp.int32, (BS, BS), 1) >> LOG2_S          # key batch id
    bias = jnp.where(rb == cb, jnp.broadcast_to(key_bias, (BS, BS)),
                     jnp.float32(NEG_INF))                               # (BS, BS)
    energy = energy + bias[None, :, :]

    m = jnp.max(energy, axis=-1, keepdims=True)
    p = jnp.exp(energy - m)
    attn = p * pl.reciprocal(jnp.sum(p, axis=-1, keepdims=True), approx=True)

    ctx = jnp.einsum("hqk,hkd->hqd",
                     attn.astype(jnp.bfloat16), v.astype(jnp.bfloat16),
                     preferred_element_type=jnp.float32)                 # (NH,BS,HD)

    # ---- concat heads (lane-offset stores) + one (BS,H)@(H,H) W_o matmul ----
    for h in range(NH):
        ctx_s[:, pl.ds(h * HD, HD)] = ctx[h]
    z = jnp.dot(ctx_s[...].astype(jnp.bfloat16), wo_ref[...],
                preferred_element_type=jnp.float32) + vec_ref[1:2, 0:H]

    # ---- residual + LayerNorm 1 (f32) ---------------------------------------
    src = _layer_norm(xf + z, vec_ref[2:3, 0:H], vec_ref[3:4, 0:H])

    # ---- pointwise feed-forward ----------------------------------------------
    h1 = jnp.dot(src.astype(jnp.bfloat16), w1_ref[...],
                 preferred_element_type=jnp.float32) + vec_ref[4:5, 0:FF]
    h1 = jnp.maximum(h1, 0.0)
    ff = jnp.dot(h1.astype(jnp.bfloat16), w2_ref[...],
                 preferred_element_type=jnp.float32) + vec_ref[5:6, 0:H]

    # ---- residual + LayerNorm 2 (f32) ----------------------------------------
    out_ref[...] = _layer_norm(src + ff, vec_ref[6:7, 0:H], vec_ref[7:8, 0:H])


# ---------------------------------------------------------------------------
# Host-side parameter packing (kernel-friendly layouts).
# ---------------------------------------------------------------------------
def _pack_params(params):
    (wq, bq, wk, bk, wv, bv, wo, bo,
     ln1g, ln1b, w1, b1, w2, b2, ln2g, ln2b) = params

    wqkv = jnp.concatenate([wq, wk, wv], axis=1).astype(jnp.bfloat16)   # (H, 3H)
    bqkv = jnp.concatenate([bq, bk, bv], axis=1)                        # (1, 3H)

    def row(vrow):                 # (1, n) -> (1, 128) zero-padded
        return jnp.pad(vrow, ((0, 0), (0, 128 - vrow.shape[1])))

    vec = jnp.concatenate(
        [row(bqkv), row(bo), row(ln1g), row(ln1b),
         row(b1), row(b2), row(ln2g), row(ln2b)], axis=0)               # (8, 128) f32

    return (wqkv, wo.astype(jnp.bfloat16), w1.astype(jnp.bfloat16),
            w2.astype(jnp.bfloat16), vec)


@jax.jit
def encoder_block(x, mask, params):
    """x: [B, S, H] f32, mask: [B, 1, S] f32 (0 = masked key position)."""
    wqkv, wo, w1, w2, vec = _pack_params(params)
    xf = x.reshape(BS, H)          # flatten batch*seq host-side (free layout op)
    maskf = mask.reshape(1, BS)    # key mask, flattened to match the BS key axis

    def const2(shape):             # full-array block, resident across the grid
        return pl.BlockSpec(shape, lambda i: (0, 0))

    out = pl.pallas_call(
        encoder_block_kernel,
        out_shape=jax.ShapeDtypeStruct((BS, H), jnp.float32),
        grid_spec=pltpu.PrefetchScalarGridSpec(
            num_scalar_prefetch=0,
            grid=(1,),
            in_specs=[
                const2((BS, H)),        # xf
                const2((1, BS)),        # flattened key mask
                const2((H, 3 * H)),     # Wq|Wk|Wv packed, bf16
                const2((H, H)),         # Wo, bf16
                const2((H, FF)),        # W1, bf16
                const2((FF, H)),        # W2, bf16
                const2((8, 128)),       # packed biases / LN params, f32
            ],
            out_specs=const2((BS, H)),
            scratch_shapes=[
                pltpu.VMEM((BS, 3 * H), jnp.float32),   # fused QKV activations
                pltpu.VMEM((BS, H), jnp.float32),       # concatenated heads
            ],
        ),
        compiler_params=pltpu.CompilerParams(
            dimension_semantics=("arbitrary",)),
    )(xf, maskf, wqkv, wo, w1, w2, vec)
    return out.reshape(B, S, H)


# ---------------------------------------------------------------------------
# Parameters + pure-JAX reference (eval-mode EncoderBlock semantics).
# ---------------------------------------------------------------------------
def init_params(key):
    ks = jax.random.split(key, 8)
    s = 0.1
    wq = s * jax.random.normal(ks[0], (H, H), jnp.float32)
    wk = s * jax.random.normal(ks[1], (H, H), jnp.float32)
    wv = s * jax.random.normal(ks[2], (H, H), jnp.float32)
    wo = s * jax.random.normal(ks[3], (H, H), jnp.float32)
    bq = jnp.zeros((1, H), jnp.float32)
    bk = jnp.zeros((1, H), jnp.float32)
    bv = jnp.zeros((1, H), jnp.float32)
    bo = jnp.zeros((1, H), jnp.float32)
    w1 = s * jax.random.normal(ks[4], (H, FF), jnp.float32)
    b1 = jnp.zeros((1, FF), jnp.float32)
    w2 = s * jax.random.normal(ks[5], (FF, H), jnp.float32)
    b2 = jnp.zeros((1, H), jnp.float32)
    ln1g = jnp.ones((1, H), jnp.float32)
    ln1b = jnp.zeros((1, H), jnp.float32)
    ln2g = jnp.ones((1, H), jnp.float32)
    ln2b = jnp.zeros((1, H), jnp.float32)
    return (wq, bq, wk, bk, wv, bv, wo, bo,
            ln1g, ln1b, w1, b1, w2, b2, ln2g, ln2b)


def encoder_block_reference(x, mask, params):
    (wq, bq, wk, bk, wv, bv, wo, bo,
     ln1g, ln1b, w1, b1, w2, b2, ln2g, ln2b) = params

    def ln(t, g, bt):
        mu = jnp.mean(t, -1, keepdims=True)
        var = jnp.mean((t - mu) ** 2, -1, keepdims=True)
        return (t - mu) * lax.rsqrt(var + LN_EPS) * g + bt

    def split(t):  # (B,S,H) -> (B,NH,S,HD)
        return t.reshape(B, S, NH, HD).transpose(0, 2, 1, 3)

    q, k, v = split(x @ wq + bq), split(x @ wk + bk), split(x @ wv + bv)
    energy = jnp.einsum("bhqd,bhkd->bhqk", q, k) / jnp.sqrt(jnp.float32(HD))
    energy = jnp.where(mask[:, :, None, :] == 0.0, NEG_INF, energy)
    attn = jax.nn.softmax(energy, axis=-1)
    ctx = jnp.einsum("bhqk,bhkd->bhqd", attn, v)
    ctx = ctx.transpose(0, 2, 1, 3).reshape(B, S, H)
    z = ctx @ wo + bo
    src = ln(x + z, ln1g, ln1b)
    ff = jax.nn.relu(src @ w1 + b1) @ w2 + b2
    return ln(src + ff, ln2g, ln2b)


if __name__ == "__main__":
    key = jax.random.PRNGKey(0)
    k_x, k_p = jax.random.split(key)

    x = jax.random.normal(k_x, (B, S, H), jnp.float32)
    # mask: last two key positions are padding (masked out), rest valid.
    mask = (jnp.arange(S) < S - 2).astype(jnp.float32)          # (S,)
    mask = jnp.broadcast_to(mask[None, None, :], (B, 1, S))     # (B, 1, S)

    params = init_params(k_p)
    out = encoder_block(x, mask, params)
    out = jax.block_until_ready(out)

    assert out.shape == (B, S, H) and out.dtype == jnp.float32
    assert bool(jnp.all(jnp.isfinite(out)))

    ref = encoder_block_reference(x, mask, params)
    # bf16 MXU operands (f32 accumulation) -> slightly looser tolerance than f32.
    assert bool(jnp.allclose(out, ref, rtol=2.5e-2, atol=2.5e-2)), float(
        jnp.max(jnp.abs(out - ref)))
    print("KERNEL_OK")
</pallas_src>

<mosaic_0001>
module attributes {stable_mosaic.version = 11 : i64} {
  func.func @encoder_block_kernel(%arg0: i32, %arg1: memref<16x32xf32, #tpu.memory_space<vmem>>, %arg2: memref<1x16xf32, #tpu.memory_space<vmem>>, %arg3: memref<32x96xbf16, #tpu.memory_space<vmem>>, %arg4: memref<32x32xbf16, #tpu.memory_space<vmem>>, %arg5: memref<32x64xbf16, #tpu.memory_space<vmem>>, %arg6: memref<64x32xbf16, #tpu.memory_space<vmem>>, %arg7: memref<8x128xf32, #tpu.memory_space<vmem>>, %arg8: memref<16x32xf32, #tpu.memory_space<vmem>>, %arg9: memref<16x96xf32, #tpu.memory_space<vmem>>, %arg10: memref<16x32xf32, #tpu.memory_space<vmem>>) attributes {dimension_semantics = [#tpu.dimension_semantics<arbitrary>], iteration_bounds = array<i64: 1>, scalar_prefetch = 0 : i64, scratch_operands = 2 : i64, tpu.core_type = #tpu.core_type<tc>, window_params = [{pipeline_mode = #tpu.pipeline_mode<synchronous>, transform_indices = @transform_0, window_bounds = array<i64: 16, 32>}, {pipeline_mode = #tpu.pipeline_mode<synchronous>, transform_indices = @transform_1, window_bounds = array<i64: 1, 16>}, {pipeline_mode = #tpu.pipeline_mode<synchronous>, transform_indices = @transform_2, window_bounds = array<i64: 32, 96>}, {pipeline_mode = #tpu.pipeline_mode<synchronous>, transform_indices = @transform_3, window_bounds = array<i64: 32, 32>}, {pipeline_mode = #tpu.pipeline_mode<synchronous>, transform_indices = @transform_4, window_bounds = array<i64: 32, 64>}, {pipeline_mode = #tpu.pipeline_mode<synchronous>, transform_indices = @transform_5, window_bounds = array<i64: 64, 32>}, {pipeline_mode = #tpu.pipeline_mode<synchronous>, transform_indices = @transform_6, window_bounds = array<i64: 8, 128>}, {pipeline_mode = #tpu.pipeline_mode<synchronous>, transform_indices = @transform_7, window_bounds = array<i64: 16, 32>}]} {
    %c0 = arith.constant 0 : index
    %c0_0 = arith.constant 0 : index
    %0 = vector.load %arg1[%c0, %c0_0] : memref<16x32xf32, #tpu.memory_space<vmem>>, vector<16x32xf32>
    %1 = arith.truncf %0 : vector<16x32xf32> to vector<16x32xbf16>
    %c0_1 = arith.constant 0 : index
    %c0_2 = arith.constant 0 : index
    %2 = vector.load %arg3[%c0_1, %c0_2] : memref<32x96xbf16, #tpu.memory_space<vmem>>, vector<32x96xbf16>
    %cst = arith.constant dense<0.000000e+00> : vector<16x96xf32>
    %3 = tpu.matmul %1, %2, %cst {dimension_numbers = #tpu.dot_dimension_numbers<[1], [0], [0], [1], [0, 0, 1, 1], [], []>} : vector<16x32xbf16>, vector<32x96xbf16>, vector<16x96xf32> -> vector<16x96xf32>
    %c0_3 = arith.constant 0 : index
    %c0_4 = arith.constant 0 : index
    %4 = vector.load %arg7[%c0_3, %c0_4] : memref<8x128xf32, #tpu.memory_space<vmem>>, vector<1x96xf32>
    %5 = vector.broadcast %4 : vector<1x96xf32> to vector<16x96xf32>
    %6 = arith.addf %3, %5 : vector<16x96xf32>
    %c0_5 = arith.constant 0 : index
    %c0_6 = arith.constant 0 : index
    %7 = vector.load %arg9[%c0_5, %c0_6] : memref<16x96xf32, #tpu.memory_space<vmem>>, vector<16x96xf32>
    tpu.vector_store %arg9[%c0_5, %c0_6], %6 {strides = array<i32>} : memref<16x96xf32, #tpu.memory_space<vmem>>, vector<16x96xf32>,
    %c0_7 = arith.constant 0 : index
    %c0_8 = arith.constant 0 : index
    %8 = vector.load %arg9[%c0_7, %c0_8] : memref<16x96xf32, #tpu.memory_space<vmem>>, vector<16x8xf32>
    %c0_9 = arith.constant 0 : index
    %c8 = arith.constant 8 : index
    %9 = vector.load %arg9[%c0_9, %c8] : memref<16x96xf32, #tpu.memory_space<vmem>>, vector<16x8xf32>
    %c0_10 = arith.constant 0 : index
    %c16 = arith.constant 16 : index
    %10 = vector.load %arg9[%c0_10, %c16] : memref<16x96xf32, #tpu.memory_space<vmem>>, vector<16x8xf32>
    %c0_11 = arith.constant 0 : index
    %c24 = arith.constant 24 : index
    %11 = vector.load %arg9[%c0_11, %c24] : memref<16x96xf32, #tpu.memory_space<vmem>>, vector<16x8xf32>
    %12 = vector.shape_cast %8 : vector<16x8xf32> to vector<1x16x8xf32>
    %13 = vector.shape_cast %9 : vector<16x8xf32> to vector<1x16x8xf32>
    %14 = vector.shape_cast %10 : vector<16x8xf32> to vector<1x16x8xf32>
    %15 = vector.shape_cast %11 : vector<16x8xf32> to vector<1x16x8xf32>
    %16 = tpu.concatenate %12, %13, %14, %15 in 0 : vector<1x16x8xf32>, vector<1x16x8xf32>, vector<1x16x8xf32>, vector<1x16x8xf32> -> vector<4x16x8xf32>
    %c0_12 = arith.constant 0 : index
    %c32 = arith.constant 32 : index
    %17 = vector.load %arg9[%c0_12, %c32] : memref<16x96xf32, #tpu.memory_space<vmem>>, vector<16x8xf32>
    %c0_13 = arith.constant 0 : index
    %c40 = arith.constant 40 : index
    %18 = vector.load %arg9[%c0_13, %c40] : memref<16x96xf32, #tpu.memory_space<vmem>>, vector<16x8xf32>
    %c0_14 = arith.constant 0 : index
    %c48 = arith.constant 48 : index
    %19 = vector.load %arg9[%c0_14, %c48] : memref<16x96xf32, #tpu.memory_space<vmem>>, vector<16x8xf32>
    %c0_15 = arith.constant 0 : index
    %c56 = arith.constant 56 : index
    %20 = vector.load %arg9[%c0_15, %c56] : memref<16x96xf32, #tpu.memory_space<vmem>>, vector<16x8xf32>
    %21 = vector.shape_cast %17 : vector<16x8xf32> to vector<1x16x8xf32>
    %22 = vector.shape_cast %18 : vector<16x8xf32> to vector<1x16x8xf32>
    %23 = vector.shape_cast %19 : vector<16x8xf32> to vector<1x16x8xf32>
    %24 = vector.shape_cast %20 : vector<16x8xf32> to vector<1x16x8xf32>
    %25 = tpu.concatenate %21, %22, %23, %24 in 0 : vector<1x16x8xf32>, vector<1x16x8xf32>, vector<1x16x8xf32>, vector<1x16x8xf32> -> vector<4x16x8xf32>
    %c0_16 = arith.constant 0 : index
    %c64 = arith.constant 64 : index
    %26 = vector.load %arg9[%c0_16, %c64] : memref<16x96xf32, #tpu.memory_space<vmem>>, vector<16x8xf32>
    %c0_17 = arith.constant 0 : index
    %c72 = arith.constant 72 : index
    %27 = vector.load %arg9[%c0_17, %c72] : memref<16x96xf32, #tpu.memory_space<vmem>>, vector<16x8xf32>
    %c0_18 = arith.constant 0 : index
    %c80 = arith.constant 80 : index
    %28 = vector.load %arg9[%c0_18, %c80] : memref<16x96xf32, #tpu.memory_space<vmem>>, vector<16x8xf32>
    %c0_19 = arith.constant 0 : index
    %c88 = arith.constant 88 : index
    %29 = vector.load %arg9[%c0_19, %c88] : memref<16x96xf32, #tpu.memory_space<vmem>>, vector<16x8xf32>
    %30 = vector.shape_cast %26 : vector<16x8xf32> to vector<1x16x8xf32>
    %31 = vector.shape_cast %27 : vector<16x8xf32> to vector<1x16x8xf32>
    %32 = vector.shape_cast %28 : vector<16x8xf32> to vector<1x16x8xf32>
    %33 = vector.shape_cast %29 : vector<16x8xf32> to vector<1x16x8xf32>
    %34 = tpu.concatenate %30, %31, %32, %33 in 0 : vector<1x16x8xf32>, vector<1x16x8xf32>, vector<1x16x8xf32>, vector<1x16x8xf32> -> vector<4x16x8xf32>
    %35 = arith.truncf %16 : vector<4x16x8xf32> to vector<4x16x8xbf16>
    %36 = arith.truncf %25 : vector<4x16x8xf32> to vector<4x16x8xbf16>
    "tpu.trace_start"() <{level = 10 : i32, message = "hqd,hkd->hqk"}> : () -> ()
    %cst_20 = arith.constant dense<0.000000e+00> : vector<4x16x16xf32>
    %37 = tpu.matmul %35, %36, %cst_20 {dimension_numbers = #tpu.dot_dimension_numbers<[2], [2], [1], [1], [0, 0, 0, 1, 1, 1], [0], [0]>} : vector<4x16x8xbf16>, vector<4x16x8xbf16>, vector<4x16x16xf32> -> vector<4x16x16xf32>
    "tpu.trace_stop"() : () -> ()
    %cst_21 = arith.constant 0.353553385 : f32
    %38 = vector.broadcast %cst_21 : f32 to vector<4x16x16xf32>
    %39 = arith.mulf %37, %38 : vector<4x16x16xf32>
    %c0_22 = arith.constant 0 : index
    %c0_23 = arith.constant 0 : index
    %40 = vector.load %arg2[%c0_22, %c0_23] : memref<1x16xf32, #tpu.memory_space<vmem>>, vector<1x16xf32>
    %cst_24 = arith.constant 0.000000e+00 : f32
    %41 = vector.broadcast %cst_24 : f32 to vector<1x16xf32>
    %42 = arith.cmpf oeq, %40, %41 : vector<1x16xf32>
    %cst_25 = arith.constant -9.99999986E+14 : f32
    %cst_26 = arith.constant 0.000000e+00 : f32
    %43 = vector.broadcast %cst_25 : f32 to vector<1x16xf32>
    %44 = vector.broadcast %cst_26 : f32 to vector<1x16xf32>
    %45 = arith.select %42, %43, %44 : vector<1x16xi1>, vector<1x16xf32>
    %46 = tpu.iota {dimensions = array<i32: 0>} : vector<16x16xi32>
    %c3_i32 = arith.constant 3 : i32
    %47 = vector.broadcast %c3_i32 : i32 to vector<16x16xi32>
    %48 = arith.shrsi %46, %47 : vector<16x16xi32>
    %49 = tpu.iota {dimensions = array<i32: 1>} : vector<16x16xi32>
    %c3_i32_27 = arith.constant 3 : i32
    %50 = vector.broadcast %c3_i32_27 : i32 to vector<16x16xi32>
    %51 = arith.shrsi %49, %50 : vector<16x16xi32>
    %52 = arith.cmpi eq, %48, %51 : vector<16x16xi32>
    %53 = vector.shape_cast %45 : vector<1x16xf32> to vector<1x16xf32>
    %54 = vector.broadcast %53 : vector<1x16xf32> to vector<16x16xf32>
    %cst_28 = arith.constant -9.99999986E+14 : f32
    %55 = vector.broadcast %cst_28 : f32 to vector<16x16xf32>
    %56 = arith.select %52, %54, %55 : vector<16x16xi1>, vector<16x16xf32>
    %57 = vector.shape_cast %56 : vector<16x16xf32> to vector<1x16x16xf32>
    %58 = vector.broadcast %57 : vector<1x16x16xf32> to vector<4x16x16xf32>
    %59 = arith.addf %39, %58 : vector<4x16x16xf32>
    %cst_29 = arith.constant dense<0xFF800000> : vector<4x16xf32>
    %60 = vector.multi_reduction <maximumf>, %59, %cst_29 [2] : vector<4x16x16xf32> to vector<4x16xf32>
    %61 = vector.shape_cast %60 : vector<4x16xf32> to vector<4x16x1xf32>
    %62 = vector.broadcast %61 : vector<4x16x1xf32> to vector<4x16x16xf32>
    %63 = arith.subf %59, %62 : vector<4x16x16xf32>
    %64 = math.exp %63 : vector<4x16x16xf32>
    %cst_30 = arith.constant dense<0.000000e+00> : vector<4x16xf32>
    %65 = vector.multi_reduction <add>, %64, %cst_30 [2] : vector<4x16x16xf32> to vector<4x16xf32>
    %66 = vector.shape_cast %65 : vector<4x16xf32> to vector<4x16x1xf32>
    %67 = tpu.reciprocal %66 {approx = true} : vector<4x16x1xf32> -> vector<4x16x1xf32>
    %68 = vector.broadcast %67 : vector<4x16x1xf32> to vector<4x16x16xf32>
    %69 = arith.mulf %64, %68 : vector<4x16x16xf32>
    %70 = arith.truncf %69 : vector<4x16x16xf32> to vector<4x16x16xbf16>
    %71 = arith.truncf %34 : vector<4x16x8xf32> to vector<4x16x8xbf16>
    "tpu.trace_start"() <{level = 10 : i32, message = "hqk,hkd->hqd"}> : () -> ()
    %cst_31 = arith.constant dense<0.000000e+00> : vector<4x16x8xf32>
    %72 = tpu.matmul %70, %71, %cst_31 {dimension_numbers = #tpu.dot_dimension_numbers<[2], [1], [1], [2], [0, 0, 0, 1, 1, 2], [0], [0]>} : vector<4x16x16xbf16>, vector<4x16x8xbf16>, vector<4x16x8xf32> -> vector<4x16x8xf32>
    "tpu.trace_stop"() : () -> ()
    %73 = vector.extract_strided_slice %72 {offsets = [0, 0, 0], sizes = [1, 16, 8], strides = [1, 1, 1]} : vector<4x16x8xf32> to vector<1x16x8xf32>
    %74 = vector.shape_cast %73 : vector<1x16x8xf32> to vector<16x8xf32>
    %c0_32 = arith.constant 0 : index
    %c0_33 = arith.constant 0 : index
    %75 = vector.load %arg10[%c0_32, %c0_33] : memref<16x32xf32, #tpu.memory_space<vmem>>, vector<16x8xf32>
    tpu.vector_store %arg10[%c0_32, %c0_33], %74 {strides = array<i32>} : memref<16x32xf32, #tpu.memory_space<vmem>>, vector<16x8xf32>,
    %76 = vector.extract_strided_slice %72 {offsets = [1, 0, 0], sizes = [1, 16, 8], strides = [1, 1, 1]} : vector<4x16x8xf32> to vector<1x16x8xf32>
    %77 = vector.shape_cast %76 : vector<1x16x8xf32> to vector<16x8xf32>
    %c0_34 = arith.constant 0 : index
    %c8_35 = arith.constant 8 : index
    %78 = vector.load %arg10[%c0_34, %c8_35] : memref<16x32xf32, #tpu.memory_space<vmem>>, vector<16x8xf32>
    tpu.vector_store %arg10[%c0_34, %c8_35], %77 {strides = array<i32>} : memref<16x32xf32, #tpu.memory_space<vmem>>, vector<16x8xf32>,
    %79 = vector.extract_strided_slice %72 {offsets = [2, 0, 0], sizes = [1, 16, 8], strides = [1, 1, 1]} : vector<4x16x8xf32> to vector<1x16x8xf32>
    %80 = vector.shape_cast %79 : vector<1x16x8xf32> to vector<16x8xf32>
    %c0_36 = arith.constant 0 : index
    %c16_37 = arith.constant 16 : index
    %81 = vector.load %arg10[%c0_36, %c16_37] : memref<16x32xf32, #tpu.memory_space<vmem>>, vector<16x8xf32>
    tpu.vector_store %arg10[%c0_36, %c16_37], %80 {strides = array<i32>} : memref<16x32xf32, #tpu.memory_space<vmem>>, vector<16x8xf32>,
    %82 = vector.extract_strided_slice %72 {offsets = [3, 0, 0], sizes = [1, 16, 8], strides = [1, 1, 1]} : vector<4x16x8xf32> to vector<1x16x8xf32>
    %83 = vector.shape_cast %82 : vector<1x16x8xf32> to vector<16x8xf32>
    %c0_38 = arith.constant 0 : index
    %c24_39 = arith.constant 24 : index
    %84 = vector.load %arg10[%c0_38, %c24_39] : memref<16x32xf32, #tpu.memory_space<vmem>>, vector<16x8xf32>
    tpu.vector_store %arg10[%c0_38, %c24_39], %83 {strides = array<i32>} : memref<16x32xf32, #tpu.memory_space<vmem>>, vector<16x8xf32>,
    %c0_40 = arith.constant 0 : index
    %c0_41 = arith.constant 0 : index
    %85 = vector.load %arg10[%c0_40, %c0_41] : memref<16x32xf32, #tpu.memory_space<vmem>>, vector<16x32xf32>
    %86 = arith.truncf %85 : vector<16x32xf32> to vector<16x32xbf16>
    %c0_42 = arith.constant 0 : index
    %c0_43 = arith.constant 0 : index
    %87 = vector.load %arg4[%c0_42, %c0_43] : memref<32x32xbf16, #tpu.memory_space<vmem>>, vector<32x32xbf16>
    %cst_44 = arith.constant dense<0.000000e+00> : vector<16x32xf32>
    %88 = tpu.matmul %86, %87, %cst_44 {dimension_numbers = #tpu.dot_dimension_numbers<[1], [0], [0], [1], [0, 0, 1, 1], [], []>} : vector<16x32xbf16>, vector<32x32xbf16>, vector<16x32xf32> -> vector<16x32xf32>
    %c1 = arith.constant 1 : index
    %c0_45 = arith.constant 0 : index
    %89 = vector.load %arg7[%c1, %c0_45] : memref<8x128xf32, #tpu.memory_space<vmem>>, vector<1x32xf32>
    %90 = vector.broadcast %89 : vector<1x32xf32> to vector<16x32xf32>
    %91 = arith.addf %88, %90 : vector<16x32xf32>
    %92 = arith.addf %0, %91 : vector<16x32xf32>
    %c2 = arith.constant 2 : index
    %c0_46 = arith.constant 0 : index
    %93 = vector.load %arg7[%c2, %c0_46] : memref<8x128xf32, #tpu.memory_space<vmem>>, vector<1x32xf32>
    %c3 = arith.constant 3 : index
    %c0_47 = arith.constant 0 : index
    %94 = vector.load %arg7[%c3, %c0_47] : memref<8x128xf32, #tpu.memory_space<vmem>>, vector<1x32xf32>
    %cst_48 = arith.constant dense<0.000000e+00> : vector<16xf32>
    %95 = vector.multi_reduction <add>, %92, %cst_48 [1] : vector<16x32xf32> to vector<16xf32>
    %96 = vector.shape_cast %95 : vector<16xf32> to vector<16x1xf32>
    %cst_49 = arith.constant 3.200000e+01 : f32
    %97 = vector.broadcast %cst_49 : f32 to vector<16x1xf32>
    %98 = arith.divf %96, %97 : vector<16x1xf32>
    %99 = vector.broadcast %98 : vector<16x1xf32> to vector<16x32xf32>
    %100 = arith.subf %92, %99 : vector<16x32xf32>
    %101 = vector.broadcast %98 : vector<16x1xf32> to vector<16x32xf32>
    %102 = arith.subf %92, %101 : vector<16x32xf32>
    %103 = arith.mulf %100, %102 : vector<16x32xf32>
    %cst_50 = arith.constant dense<0.000000e+00> : vector<16xf32>
    %104 = vector.multi_reduction <add>, %103, %cst_50 [1] : vector<16x32xf32> to vector<16xf32>
    %105 = vector.shape_cast %104 : vector<16xf32> to vector<16x1xf32>
    %cst_51 = arith.constant 3.200000e+01 : f32
    %106 = vector.broadcast %cst_51 : f32 to vector<16x1xf32>
    %107 = arith.divf %105, %106 : vector<16x1xf32>
    %108 = vector.broadcast %98 : vector<16x1xf32> to vector<16x32xf32>
    %109 = arith.subf %92, %108 : vector<16x32xf32>
    %cst_52 = arith.constant 9.99999974E-6 : f32
    %110 = vector.broadcast %cst_52 : f32 to vector<16x1xf32>
    %111 = arith.addf %107, %110 : vector<16x1xf32>
    %112 = math.rsqrt %111 : vector<16x1xf32>
    %113 = vector.broadcast %112 : vector<16x1xf32> to vector<16x32xf32>
    %114 = arith.mulf %109, %113 : vector<16x32xf32>
    %115 = vector.broadcast %93 : vector<1x32xf32> to vector<16x32xf32>
    %116 = arith.mulf %114, %115 : vector<16x32xf32>
    %117 = vector.broadcast %94 : vector<1x32xf32> to vector<16x32xf32>
    %118 = arith.addf %116, %117 : vector<16x32xf32>
    %119 = arith.truncf %118 : vector<16x32xf32> to vector<16x32xbf16>
    %c0_53 = arith.constant 0 : index
    %c0_54 = arith.constant 0 : index
    %120 = vector.load %arg5[%c0_53, %c0_54] : memref<32x64xbf16, #tpu.memory_space<vmem>>, vector<32x64xbf16>
    %cst_55 = arith.constant dense<0.000000e+00> : vector<16x64xf32>
    %121 = tpu.matmul %119, %120, %cst_55 {dimension_numbers = #tpu.dot_dimension_numbers<[1], [0], [0], [1], [0, 0, 1, 1], [], []>} : vector<16x32xbf16>, vector<32x64xbf16>, vector<16x64xf32> -> vector<16x64xf32>
    %c4 = arith.constant 4 : index
    %c0_56 = arith.constant 0 : index
    %122 = vector.load %arg7[%c4, %c0_56] : memref<8x128xf32, #tpu.memory_space<vmem>>, vector<1x64xf32>
    %123 = vector.broadcast %122 : vector<1x64xf32> to vector<16x64xf32>
    %124 = arith.addf %121, %123 : vector<16x64xf32>
    %cst_57 = arith.constant 0.000000e+00 : f32
    %125 = vector.broadcast %cst_57 : f32 to vector<16x64xf32>
    %126 = arith.maximumf %124, %125 : vector<16x64xf32>
    %127 = arith.truncf %126 : vector<16x64xf32> to vector<16x64xbf16>
    %c0_58 = arith.constant 0 : index
    %c0_59 = arith.constant 0 : index
    %128 = vector.load %arg6[%c0_58, %c0_59] : memref<64x32xbf16, #tpu.memory_space<vmem>>, vector<64x32xbf16>
    %cst_60 = arith.constant dense<0.000000e+00> : vector<16x32xf32>
    %129 = tpu.matmul %127, %128, %cst_60 {dimension_numbers = #tpu.dot_dimension_numbers<[1], [0], [0], [1], [0, 0, 1, 1], [], []>} : vector<16x64xbf16>, vector<64x32xbf16>, vector<16x32xf32> -> vector<16x32xf32>
    %c5 = arith.constant 5 : index
    %c0_61 = arith.constant 0 : index
    %130 = vector.load %arg7[%c5, %c0_61] : memref<8x128xf32, #tpu.memory_space<vmem>>, vector<1x32xf32>
    %131 = vector.broadcast %130 : vector<1x32xf32> to vector<16x32xf32>
    %132 = arith.addf %129, %131 : vector<16x32xf32>
    %133 = arith.addf %118, %132 : vector<16x32xf32>
    %c6 = arith.constant 6 : index
    %c0_62 = arith.constant 0 : index
    %134 = vector.load %arg7[%c6, %c0_62] : memref<8x128xf32, #tpu.memory_space<vmem>>, vector<1x32xf32>
    %c7 = arith.constant 7 : index
    %c0_63 = arith.constant 0 : index
    %135 = vector.load %arg7[%c7, %c0_63] : memref<8x128xf32, #tpu.memory_space<vmem>>, vector<1x32xf32>
    %cst_64 = arith.constant dense<0.000000e+00> : vector<16xf32>
    %136 = vector.multi_reduction <add>, %133, %cst_64 [1] : vector<16x32xf32> to vector<16xf32>
    %137 = vector.shape_cast %136 : vector<16xf32> to vector<16x1xf32>
    %cst_65 = arith.constant 3.200000e+01 : f32
    %138 = vector.broadcast %cst_65 : f32 to vector<16x1xf32>
    %139 = arith.divf %137, %138 : vector<16x1xf32>
    %140 = vector.broadcast %139 : vector<16x1xf32> to vector<16x32xf32>
    %141 = arith.subf %133, %140 : vector<16x32xf32>
    %142 = vector.broadcast %139 : vector<16x1xf32> to vector<16x32xf32>
    %143 = arith.subf %133, %142 : vector<16x32xf32>
    %144 = arith.mulf %141, %143 : vector<16x32xf32>
    %cst_66 = arith.constant dense<0.000000e+00> : vector<16xf32>
    %145 = vector.multi_reduction <add>, %144, %cst_66 [1] : vector<16x32xf32> to vector<16xf32>
    %146 = vector.shape_cast %145 : vector<16xf32> to vector<16x1xf32>
    %cst_67 = arith.constant 3.200000e+01 : f32
    %147 = vector.broadcast %cst_67 : f32 to vector<16x1xf32>
    %148 = arith.divf %146, %147 : vector<16x1xf32>
    %149 = vector.broadcast %139 : vector<16x1xf32> to vector<16x32xf32>
    %150 = arith.subf %133, %149 : vector<16x32xf32>
    %cst_68 = arith.constant 9.99999974E-6 : f32
    %151 = vector.broadcast %cst_68 : f32 to vector<16x1xf32>
    %152 = arith.addf %148, %151 : vector<16x1xf32>
    %153 = math.rsqrt %152 : vector<16x1xf32>
    %154 = vector.broadcast %153 : vector<16x1xf32> to vector<16x32xf32>
    %155 = arith.mulf %150, %154 : vector<16x32xf32>
    %156 = vector.broadcast %134 : vector<1x32xf32> to vector<16x32xf32>
    %157 = arith.mulf %155, %156 : vector<16x32xf32>
    %158 = vector.broadcast %135 : vector<1x32xf32> to vector<16x32xf32>
    %159 = arith.addf %157, %158 : vector<16x32xf32>
    %c0_69 = arith.constant 0 : index
    %c0_70 = arith.constant 0 : index
    %160 = vector.load %arg8[%c0_69, %c0_70] : memref<16x32xf32, #tpu.memory_space<vmem>>, vector<16x32xf32>
    tpu.vector_store %arg8[%c0_69, %c0_70], %159 {strides = array<i32>} : memref<16x32xf32, #tpu.memory_space<vmem>>, vector<16x32xf32>,
    return
  }
  func.func @transform_0(%arg0: i32) -> (i32, i32) {
    %c0_i32 = arith.constant 0 : i32
    %c0_i32_0 = arith.constant 0 : i32
    %c0_i32_1 = arith.constant 0 : i32
    return %c0_i32, %c0_i32_0 : i32, i32
  }
  func.func @transform_1(%arg0: i32) -> (i32, i32) {
    %c0_i32 = arith.constant 0 : i32
    %c0_i32_0 = arith.constant 0 : i32
    %c0_i32_1 = arith.constant 0 : i32
    return %c0_i32, %c0_i32_0 : i32, i32
  }
  func.func @transform_2(%arg0: i32) -> (i32, i32) {
    %c0_i32 = arith.constant 0 : i32
    %c0_i32_0 = arith.constant 0 : i32
    %c0_i32_1 = arith.constant 0 : i32
    return %c0_i32, %c0_i32_0 : i32, i32
  }
  func.func @transform_3(%arg0: i32) -> (i32, i32) {
    %c0_i32 = arith.constant 0 : i32
    %c0_i32_0 = arith.constant 0 : i32
    %c0_i32_1 = arith.constant 0 : i32
    return %c0_i32, %c0_i32_0 : i32, i32
  }
  func.func @transform_4(%arg0: i32) -> (i32, i32) {
    %c0_i32 = arith.constant 0 : i32
    %c0_i32_0 = arith.constant 0 : i32
    %c0_i32_1 = arith.constant 0 : i32
    return %c0_i32, %c0_i32_0 : i32, i32
  }
  func.func @transform_5(%arg0: i32) -> (i32, i32) {
    %c0_i32 = arith.constant 0 : i32
    %c0_i32_0 = arith.constant 0 : i32
    %c0_i32_1 = arith.constant 0 : i32
    return %c0_i32, %c0_i32_0 : i32, i32
  }
  func.func @transform_6(%arg0: i32) -> (i32, i32) {
    %c0_i32 = arith.constant 0 : i32
    %c0_i32_0 = arith.constant 0 : i32
    %c0_i32_1 = arith.constant 0 : i32
    return %c0_i32, %c0_i32_0 : i32, i32
  }
  func.func @transform_7(%arg0: i32) -> (i32, i32) {
    %c0_i32 = arith.constant 0 : i32
    %c0_i32_0 = arith.constant 0 : i32
    %c0_i32_1 = arith.constant 0 : i32
    return %c0_i32, %c0_i32_0 : i32, i32
  }
}

</mosaic_0001>

<bundles_post_ra>
// kernel: encoder_block.1
= control target key start
LH: loop header
LB: loop body
LE: loop exit
PB: predicated region body
PF: predicated region fallthrough
CT: control target
= control target key end

     0   :  { %s1126_s0 = inlined_call_operand.vmem [shape: f32[16,32], index: 0, kind: input, shape index: {}]   ;;  %s1127_s1 = inlined_call_operand.vmem [shape: f32[1,16], index: 1, kind: input, shape index: {}]   ;;  %s1128_s2 = inlined_call_operand.vmem [shape: bf16[32,96], index: 2, kind: input, shape index: {}]   ;;  %s1129_s3 = inlined_call_operand.vmem [shape: bf16[32,32], index: 3, kind: input, shape index: {}]   ;;  %s1130_s4 = inlined_call_operand.vmem [shape: bf16[32,64], index: 4, kind: input, shape index: {}]   ;;  %s1131_s5 = inlined_call_operand.vmem [shape: bf16[64,32], index: 5, kind: input, shape index: {}]   ;;  %s1132_s6 = inlined_call_operand.vmem [shape: f32[8,128], index: 6, kind: input, shape index: {}]   ;;  %s1133_s7 = inlined_call_operand.hbm [shape: f32[16,32], index: 7, kind: output, shape index: {}]  }
   0x1   :  { %v792_v0 = vld [vmem:[%s1128_s2 + $0x8] sm:$0xff]  ;;  %v791_v1 = vld [vmem:[%s1128_s2] sm:$0xff] }
   0x2   :  { %v965_v2 = vld [vmem:[%s1126_s0] sm:$0xff]  ;;  %v970_v3 = vld [vmem:[%s1126_s0 + $0x8] sm:$0xff]  ;;  %59 = vmatpush.bf16.msra.mxu0 %v792_v0 }
   0x3   :  { %12 = vsyncpa [#allocation5], 0  ;;  %v30_v4 = vpack.c.bf16 %v970_v3, %v965_v2  ;;  %vm49_vm0 = vcmask 261120   ;;  %v828_v5 = vld [vmem:[%s1132_s6] ss:$0 sm:$0xff]  ;;  %vm67_vm1 = vcmask 785408   ;;  %v220_v50 = vlaneseq }
   0x4   :  { %s904_s0 = smov 104   ;;  %s905_s10 = smov 120   ;;  %vm107_vm2 = vcmask 64512   ;;  %v217_v51 = vld [vmem:[%s1127_s1] sm:$0x1]  ;;  %v908_v54 = vmov 0.0  }
   0x5   :  { %s906_s11 = smov 112   ;;  %s907_s12 = smov 96   ;;  %v221_v52 = vshrl.u32 %v220_v50, 7  ;;  %v226_v53 = vand.u32 127, %v220_v50  ;;  %vm218_vm3 = vcmp.eq.f32.partialorder %v217_v51, 0.0  ;;  %vm243_vm5 = vcmask 130048  }
   0x6   :  { %60 = vmatpush.bf16.msra.mxu0 %v791_v1  ;;  %v219_v55 = vsel %vm218_vm3, -1e+15, %v908_v54  ;;  %s909_s1 = smov 64   ;;  %s910_s15 = smov 8   ;;  %vm450_vm7 = vcmask 130112   ;;  %vm461_vm8 = vcmask 195712  }
   0x7   :  { %v223_v56 = vshra.s32 %v221_v52, 3  ;;  %v227_v57 = vshra.s32 %v226_v53, 3  ;;  %v231_v58 = vperm.slane %v219_v55, 0  ;;  %s911_s16 = smov 16   ;;  %s912_s17 = smov 24   ;;  %vm472_vm9 = vcmask 261312  }
   0x8   :  { %s914_s20 = smov [#allocation4]   ;;  %s727_s23 = sshll.u32 %s1133_s7, 4  ;;  %s728_s23 = int_to_ptr.hbm [resolvable:$true] %s727_s23 }
   0x9   :  { %747 = vmatmul.msk.bf16.vlgmr.msra.gmra.mxu0 %vm49_vm0, %v30_v4  ;;  %vm228_vm4 = vcmp.eq.s32.totalorder %v223_v56, %v227_v57  ;;  %s725_s21 = sshll.u32 %s914_s20, 4  ;;  %s726_s21 = int_to_ptr.vmem [resolvable:$true] %s725_s21 }
   0xa   :  { %v233_v62 = vsel %vm228_vm4, %v231_v58, -1e+15 }
  0x86   :  { %v62_v6 = vpop.f32.mrf.mxu0 }
  0x87   :  { %v63_v7 = vadd.f32 %v828_v5, %v62_v6  ;;  %v222_v6 = vadd.s32 8, %v221_v52 }
  0x89   :  { %68 = vst.msk [vmem:[#allocation2] sm:$0xff] %vm67_vm1, %v63_v7 }
  0x8e   :  { %v64_v8 = vpop.f32.mrf.mxu0 }
  0x8f   :  { %v65_v9 = vadd.f32 %v828_v5, %v64_v8 }
  0x90   :  { %v70_v10 = vld [vmem:[#allocation2] sm:$0xff] }
  0x91   :  { %69 = vst.msk [vmem:[#allocation2 + $0x8] sm:$0xff] %vm67_vm1, %v65_v9  ;;  %v92_v14 = vpack.c.bf16 %v70_v10, %v70_v10 }
  0x93   :  { %v102_v16 = vunpack.c.l.b16 %v92_v14 }
  0x98   :  { %v71_v11 = vld [vmem:[#allocation2 + $0x8] sm:$0xff] }
  0x99   :  { %v823_v12 = vpack.i.bf16 %v71_v11, %v70_v10  ;;  %v93_v13 = vpack.c.bf16 %v71_v11, %v71_v11  ;;  %v224_v11 = vshra.s32 %v222_v6, 3 }
  0x9b   :  { %824 = vrot.lane.b32.xlu1 %v823_v12, %s904_s0  ;;  %814 = vrot.lane.b32.xlu0 %v823_v12, %s905_s10  ;;  %v103_v15 = vunpack.c.l.b16 %v93_v13  ;;  %vm229_vm6 = vcmp.eq.s32.totalorder %v224_v11, %v227_v57 }
  0x9d   :  { %v978_v17 = vpack.c.b16 %v103_v15, %v102_v16 }
  0xa3   :  { %819 = vrot.lane.b32.xlu0 %v823_v12, %s906_s11 }
  0xab   :  { %105 = vrot.lane.b32.xlu0 %v978_v17, %s907_s12 }
 0x10d   :  { %v815_v18 = vpop.permute.xlu0 %814  ;;  %v825_v26 = vpop.permute.xlu1 %824 }
 0x10e   :  { %v817_v19 = vunpack.i.h.bf16 %v815_v18  ;;  %v816_v20 = vunpack.i.l.bf16 %v815_v18  ;;  %v827_v30 = vunpack.i.h.bf16 %v825_v26  ;;  %v826_v31 = vunpack.i.l.bf16 %v825_v26 }
 0x110   :  { %v95_v21 = vpack.c.bf16 %v817_v19, %v817_v19  ;;  %v94_v22 = vpack.c.bf16 %v816_v20, %v816_v20  ;;  %v99_v36 = vpack.c.bf16 %v827_v30, %v827_v30  ;;  %v98_v37 = vpack.c.bf16 %v826_v31, %v826_v31 }
 0x111   :  { %v234_v20 = vsel %vm229_vm6, %v231_v58, -1e+15 }
 0x112   :  { %v131_v23 = vunpack.c.l.b16 %v95_v21  ;;  %v130_v24 = vunpack.c.l.b16 %v94_v22  ;;  %v185_v41 = vunpack.c.l.b16 %v99_v36  ;;  %v184_v42 = vunpack.c.l.b16 %v98_v37 }
 0x114   :  { %v982_v25 = vpack.c.b16 %v131_v23, %v130_v24  ;;  %v991_v43 = vpack.c.b16 %v185_v41, %v184_v42 }
 0x115   :  { %v820_v27 = vpop.permute.xlu0 %819 }
 0x116   :  { %v822_v28 = vunpack.i.h.bf16 %v820_v27  ;;  %v821_v29 = vunpack.i.l.bf16 %v820_v27  ;;  %133 = vrot.lane.b32.xlu1 %v982_v25, %s907_s12 }
 0x118   :  { %v97_v32 = vpack.c.bf16 %v822_v28, %v822_v28  ;;  %v96_v33 = vpack.c.bf16 %v821_v29, %v821_v29 }
 0x11a   :  { %v158_v34 = vunpack.c.l.b16 %v97_v32  ;;  %v157_v35 = vunpack.c.l.b16 %v96_v33 }
 0x11c   :  { %v986_v38 = vpack.c.b16 %v158_v34, %v157_v35 }
 0x11d   :  { %v106_v39 = vpop.permute.xlu0 %105 }
 0x11e   :  { %160 = vrot.lane.b32.xlu2 %v986_v38, %s907_s12  ;;  %v112_v40 = vsel %vm107_vm2, %v106_v39, 0 }
 0x11f   :  { %121 = vmatpush.bf16.xpose.msra.mxu1 %v112_v40 }
 0x126   :  { %187 = vrot.lane.b32.xlu2 %v991_v43, %s907_s12  ;;  %748 = vmatmul.msk.bf16.vlgmr.msra.gmra.mxu1 %vm107_vm2, %v978_v17 }
 0x178   :  { %v161_v44 = vpop.permute.xlu2 %160 }
 0x179   :  { %v166_v45 = vsel %vm107_vm2, %v161_v44, 0 }
 0x17a   :  { %175 = vmatpush.bf16.xpose.msra.mxu3 %v166_v45 }
 0x180   :  { %v188_v46 = vpop.permute.xlu2 %187 }
 0x181   :  { %750 = vmatmul.msk.bf16.vlgmr.msra.gmra.mxu3 %vm107_vm2, %v986_v38  ;;  %v193_v47 = vsel %vm107_vm2, %v188_v46, 0 }
 0x182   :  { %202 = vmatpush.bf16.xpose.msrb.mxu0 %v193_v47 }
 0x188   :  { %v134_v48 = vpop.permute.xlu1 %133 }
 0x189   :  { %751 = vmatmul.msk.bf16.vlgmr.msrb.gmra.mxu0 %vm107_vm2, %v991_v43  ;;  %v139_v49 = vsel %vm107_vm2, %v134_v48, 0 }
 0x18a   :  { %148 = vmatpush.bf16.xpose.msra.mxu2 %v139_v49 }
 0x191   :  { %749 = vmatmul.msk.bf16.vlgmr.msra.gmra.mxu2 %vm107_vm2, %v982_v25 }
 0x1a3   :  { %v123_v61 = vpop.f32.mrf.mxu1 }
 0x1a4   :  { %v209_v0 = vmul.f32 0.35355338, %v123_v61 }
 0x1a6   :  { %v1010_v4 = vadd.f32 %v233_v62, %v209_v0 }
 0x1a8   :  { %v244_v5 = vsel %vm243_vm5, %v1010_v4, -inf }
 0x1ab   :  { %v125_v18 = vpop.f32.mrf.mxu1 }
 0x1ac   :  { %v210_v22 = vmul.f32 0.35355338, %v125_v18 }
 0x1ae   :  { %v236_v28 = vadd.f32 %v234_v20, %v210_v22 }
 0x1b0   :  { %v247_v32 = vsel %vm243_vm5, %v236_v28, -inf }
 0x204   :  { %v177_v59 = vpop.f32.mrf.mxu3 }
 0x205   :  { %v213_v60 = vmul.f32 0.35355338, %v177_v59 }
 0x206   :  { %v204_v9 = vpop.f32.mrf.mxu0 }
 0x207   :  { %v239_v63 = vadd.f32 %v233_v62, %v213_v60  ;;  %v215_v12 = vmul.f32 0.35355338, %v204_v9 }
 0x209   :  { %v256_v1 = vsel %vm243_vm5, %v239_v63, -inf  ;;  %v241_v16 = vadd.f32 %v233_v62, %v215_v12 }
 0x20a   :  { %257 = vmax.xlane.f32.xlu0 %v256_v1 }
 0x20b   :  { %v262_v24 = vsel %vm243_vm5, %v241_v16, -inf }
 0x20c   :  { %v179_v19 = vpop.f32.mrf.mxu3 }
 0x20d   :  { %v214_v23 = vmul.f32 0.35355338, %v179_v19 }
 0x20e   :  { %v206_v29 = vpop.f32.mrf.mxu0 }
 0x20f   :  { %v240_v27 = vadd.f32 %v234_v20, %v214_v23  ;;  %v216_v30 = vmul.f32 0.35355338, %v206_v29 }
 0x211   :  { %v259_v31 = vsel %vm243_vm5, %v240_v27, -inf  ;;  %v242_v33 = vadd.f32 %v234_v20, %v216_v30 }
 0x212   :  { %245 = vmax.xlane.f32.xlu0 %v244_v5 }
 0x213   :  { %v265_v34 = vsel %vm243_vm5, %v242_v33, -inf }
 0x214   :  { %v150_v7 = vpop.f32.mrf.mxu2 }
 0x215   :  { %v211_v8 = vmul.f32 0.35355338, %v150_v7 }
 0x217   :  { %v237_v10 = vadd.f32 %v233_v62, %v211_v8 }
 0x219   :  { %v250_v13 = vsel %vm243_vm5, %v237_v10, -inf }
 0x21a   :  { %251 = vmax.xlane.f32.xlu1 %v250_v13 }
 0x21c   :  { %v152_v14 = vpop.f32.mrf.mxu2 }
 0x21d   :  { %v212_v15 = vmul.f32 0.35355338, %v152_v14 }
 0x21f   :  { %v238_v21 = vadd.f32 %v234_v20, %v212_v15 }
 0x221   :  { %v253_v26 = vsel %vm243_vm5, %v238_v21, -inf }
 0x222   :  { %263 = vmax.xlane.f32.xlu1 %v262_v24  ;;  %254 = vmax.xlane.f32.xlu2 %v253_v26 }
 0x22a   :  { %260 = vmax.xlane.f32.xlu2 %v259_v31  ;;  %248 = vmax.xlane.f32.xlu1 %v247_v32 }
 0x232   :  { %266 = vmax.xlane.f32.xlu2 %v265_v34 }
 0x27d   :  { %v258_v35 = vpop.xlane.xlu0 %257 }
 0x27e   :  { %v272_v36 = vsub.f32 %v239_v63, %v258_v35 }
 0x280   :  { %v284_v37 = vmul.f32 1.442695, %v272_v36 }
 0x282   :  { %836 = vpow2.f32 %v284_v37 }
 0x285   :  { %v246_v6 = vpop.xlane.xlu0 %245 }
 0x286   :  { %v268_v7 = vsub.f32 %v1010_v4, %v246_v6 }
 0x288   :  { %v1020_v39 = vpop.eup %836 }
 0x289   :  { %v304_v40 = vsel %vm243_vm5, %v1020_v39, 0.0 }
 0x28a   :  { %305 = vadd.xlane.f32.xlu1 %v304_v40 }
 0x28d   :  { %v252_v41 = vpop.xlane.xlu1 %251 }
 0x28e   :  { %v270_v42 = vsub.f32 %v237_v10, %v252_v41  ;;  %v276_v10 = vmul.f32 1.442695, %v268_v7 }
 0x290   :  { %v280_v44 = vmul.f32 1.442695, %v270_v42 }
 0x292   :  { %838 = vpow2.f32 %v280_v44 }
 0x295   :  { %v264_v45 = vpop.xlane.xlu1 %263  ;;  %v255_v46 = vpop.xlane.xlu2 %254 }
 0x296   :  { %v274_v47 = vsub.f32 %v241_v16, %v264_v45  ;;  %v271_v50 = vsub.f32 %v238_v21, %v255_v46 }
 0x298   :  { %v839_v48 = vpop.eup %838  ;;  %v288_v49 = vmul.f32 1.442695, %v274_v47  ;;  %v282_v52 = vmul.f32 1.442695, %v271_v50 }
 0x299   :  { %v298_v51 = vsel %vm243_vm5, %v839_v48, 0.0 }
 0x29a   :  { %840 = vpow2.f32 %v288_v49  ;;  %299 = vadd.xlane.f32.xlu2 %v298_v51 }
 0x29b   :  { %842 = vpow2.f32 %v282_v52 }
 0x29d   :  { %v261_v53 = vpop.xlane.xlu2 %260  ;;  %v249_v8 = vpop.xlane.xlu1 %248 }
 0x29e   :  { %v273_v54 = vsub.f32 %v240_v27, %v261_v53  ;;  %v269_v9 = vsub.f32 %v236_v28, %v249_v8 }
 0x2a0   :  { %v1025_v55 = vpop.eup %840  ;;  %v286_v56 = vmul.f32 1.442695, %v273_v54  ;;  %v278_v11 = vmul.f32 1.442695, %v269_v9 }
 0x2a1   :  { %v310_v57 = vsel %vm243_vm5, %v1025_v55, 0.0  ;;  %v843_v59 = vpop.eup %842 }
 0x2a2   :  { %844 = vpow2.f32 %v286_v56  ;;  %311 = vadd.xlane.f32.xlu0 %v310_v57  ;;  %v301_v0 = vsel %vm243_vm5, %v843_v59, 0.0 }
 0x2a5   :  { %v267_v58 = vpop.xlane.xlu2 %266 }
 0x2a6   :  { %v275_v60 = vsub.f32 %v242_v33, %v267_v58 }
 0x2a8   :  { %v845_v61 = vpop.eup %844  ;;  %v290_v62 = vmul.f32 1.442695, %v275_v60 }
 0x2a9   :  { %v307_v63 = vsel %vm243_vm5, %v845_v61, 0.0 }
 0x2aa   :  { %846 = vpow2.f32 %v290_v62  ;;  %308 = vadd.xlane.f32.xlu2 %v307_v63  ;;  %302 = vadd.xlane.f32.xlu0 %v301_v0 }
 0x2ab   :  { %848 = vpow2.f32 %v276_v10  ;;  %v794_v10 = vld [vmem:[%s1129_s3 + $0x8] sm:$0xff] }
 0x2ac   :  { %850 = vpow2.f32 %v278_v11  ;;  %v793_v11 = vld [vmem:[%s1129_s3] sm:$0xff] }
 0x2b0   :  { %v847_v1 = vpop.eup %846 }
 0x2b1   :  { %v313_v5 = vsel %vm243_vm5, %v847_v1, 0.0  ;;  %v849_v12 = vpop.eup %848 }
 0x2b2   :  { %314 = vadd.xlane.f32.xlu1 %v313_v5  ;;  %v1037_v13 = vpop.eup %850 }
 0x2be   :  { %395 = vrot.lane.b32.xlu0 %v986_v38, %s909_s1  ;;  %v292_v38 = vsel %vm243_vm5, %v849_v12, 0.0 }
 0x2c2   :  { %370 = vrot.lane.b32.xlu2 %v982_v25, %s909_s1  ;;  %v295_v25 = vsel %vm243_vm5, %v1037_v13, 0.0 }
 0x2cb   :  { %420 = vrot.lane.b32.xlu1 %v991_v43, %s909_s1 }
 0x2d3   :  { %345 = vrot.lane.b32.xlu1 %v978_v17, %s909_s1 }
 0x2e8   :  { %293 = vadd.xlane.f32.xlu0 %v292_v38 }
 0x2eb   :  { %296 = vadd.xlane.f32.xlu2 %v295_v25 }
 0x2fd   :  { %v306_v4 = vpop.xlane.xlu1 %305 }
 0x30d   :  { %v300_v43 = vpop.xlane.xlu2 %299 }
 0x30e   :  { %852 = vrcp.f32 %v300_v43 }
 0x30f   :  { %854 = vrcp.f32 %v306_v4 }
 0x314   :  { %v853_v16 = vpop.eup %852 }
 0x315   :  { %v312_v17 = vpop.xlane.xlu0 %311  ;;  %v326_v18 = vmul.f32 %v853_v16, %v839_v48  ;;  %v855_v19 = vpop.eup %854  ;;  %v829_v16 = vld [vmem:[%s1132_s6 + $0x1] ss:$0 sm:$0xff] }
 0x316   :  { %v328_v28 = vmul.f32 %v855_v19, %v1020_v39 }
 0x317   :  { %v334_v23 = vpack.c.bf16 %v326_v18, %v326_v18 }
 0x318   :  { %v336_v33 = vpack.c.bf16 %v328_v28, %v328_v28 }
 0x319   :  { %v367_v30 = vunpack.c.l.b16 %v334_v23 }
 0x31a   :  { %v392_v37 = vunpack.c.l.b16 %v336_v33 }
 0x31d   :  { %v309_v14 = vpop.xlane.xlu2 %308  ;;  %v303_v15 = vpop.xlane.xlu0 %302 }
 0x31e   :  { %856 = vrcp.f32 %v309_v14 }
 0x31f   :  { %858 = vrcp.f32 %v303_v15 }
 0x324   :  { %v857_v20 = vpop.eup %856 }
 0x325   :  { %v859_v21 = vpop.eup %858  ;;  %v371_v22 = vpop.permute.xlu2 %370  ;;  %v329_v24 = vmul.f32 %v857_v20, %v845_v61 }
 0x326   :  { %v327_v26 = vmul.f32 %v859_v21, %v843_v59  ;;  %383 = vmatpush.bf16.msrb.mxu2 %v371_v22  ;;  %v315_v27 = vpop.xlane.xlu1 %314 }
 0x327   :  { %v337_v31 = vpack.c.bf16 %v329_v24, %v329_v24  ;;  %860 = vrcp.f32 %v315_v27  ;;  %v913_v27 = vmov 32.0  }
 0x328   :  { %v335_v29 = vpack.c.bf16 %v327_v26, %v327_v26  ;;  %862 = vrcp.f32 %v312_v17 }
 0x329   :  { %v393_v35 = vunpack.c.l.b16 %v337_v31 }
 0x32a   :  { %v368_v32 = vunpack.c.l.b16 %v335_v29 }
 0x32b   :  { %v394_v42 = vpack.c.b16 %v393_v35, %v392_v37 }
 0x32c   :  { %v369_v34 = vpack.c.b16 %v368_v32, %v367_v30 }
 0x32d   :  { %v861_v36 = vpop.eup %860 }
 0x32e   :  { %753 = vmatmul.msk.bf16.vlgmr.msrb.gmra.mxu2 %vm243_vm5, %v369_v34  ;;  %v863_v41 = vpop.eup %862  ;;  %v331_v44 = vmul.f32 %v861_v36, %v847_v1 }
 0x32f   :  { %v330_v39 = vmul.f32 %v863_v41, %v1025_v55 }
 0x330   :  { %v396_v40 = vpop.permute.xlu0 %395  ;;  %v339_v45 = vpack.c.bf16 %v331_v44, %v331_v44 }
 0x331   :  { %408 = vmatpush.bf16.msrb.mxu3 %v396_v40  ;;  %v338_v46 = vpack.c.bf16 %v330_v39, %v330_v39  ;;  %v796_v39 = vld [vmem:[%s1130_s4 + $0x8] sm:$0xff] }
 0x332   :  { %v418_v47 = vunpack.c.l.b16 %v339_v45  ;;  %602 = vmatpush.bf16.msra.mxu2 %v796_v39 }
 0x333   :  { %v417_v48 = vunpack.c.l.b16 %v338_v46 }
 0x334   :  { %754 = vmatmul.msk.bf16.vlgmr.msrb.gmra.mxu3 %vm243_vm5, %v394_v42 }
 0x335   :  { %v419_v50 = vpack.c.b16 %v418_v47, %v417_v48  ;;  %v795_v47 = vld [vmem:[%s1130_s4] sm:$0xff] }
 0x336   :  { %603 = vmatpush.bf16.msra.mxu2 %v795_v47 }
 0x33d   :  { %v421_v49 = vpop.permute.xlu1 %420 }
 0x33e   :  { %433 = vmatpush.bf16.msra.mxu0 %v421_v49 }
 0x341   :  { %755 = vmatmul.msk.bf16.vlgmr.msra.gmra.mxu0 %vm243_vm5, %v419_v50 }
 0x345   :  { %v346_v51 = vpop.permute.xlu1 %345 }
 0x346   :  { %358 = vmatpush.bf16.msrb.mxu1 %v346_v51 }
 0x34a   :  { %505 = vmatpush.bf16.msra.mxu1 %v794_v10 }
 0x34e   :  { %506 = vmatpush.bf16.msra.mxu1 %v793_v11 }
 0x35b   :  { %v294_v52 = vpop.xlane.xlu0 %293 }
 0x35c   :  { %864 = vrcp.f32 %v294_v52 }
 0x35e   :  { %v297_v53 = vpop.xlane.xlu2 %296 }
 0x35f   :  { %866 = vrcp.f32 %v297_v53 }
 0x360   :  { %868 = vrcp.f32 %v913_v27 }
 0x362   :  { %v865_v54 = vpop.eup %864 }
 0x363   :  { %v324_v56 = vmul.f32 %v865_v54, %v849_v12 }
 0x365   :  { %v867_v57 = vpop.eup %866  ;;  %v332_v58 = vpack.c.bf16 %v324_v56, %v324_v56 }
 0x366   :  { %v325_v55 = vmul.f32 %v867_v57, %v1037_v13  ;;  %v869_v28 = vpop.eup %868 }
 0x367   :  { %v342_v60 = vunpack.c.l.b16 %v332_v58  ;;  %v524_v29 = vmul.f32 32.0, %v869_v28  ;;  %vm528_vm10 = vweird.f32 %v869_v28 }
 0x368   :  { %v333_v59 = vpack.c.bf16 %v325_v55, %v325_v55 }
 0x369   :  { %v525_v30 = vsub.f32 1.0, %v524_v29 }
 0x36a   :  { %v343_v61 = vunpack.c.l.b16 %v333_v59 }
 0x36b   :  { %v526_v31 = vmul.f32 %v869_v28, %v525_v30 }
 0x36c   :  { %v344_v62 = vpack.c.b16 %v343_v61, %v342_v60 }
 0x36d   :  { %v527_v32 = vadd.f32 %v869_v28, %v526_v31 }
 0x36e   :  { %752 = vmatmul.msk.bf16.vlgmr.msrb.gmra.mxu1 %vm243_vm5, %v344_v62 }
 0x36f   :  { %v1067_v33 = vsel %vm528_vm10, %v869_v28, %v527_v32 }
 0x3b1   :  { %v385_v63 = vpop.f32.mrf.mxu2 }
 0x3b2   :  { %444 = vrot.lane.b32.xlu1 %v385_v63, %s910_s15 }
 0x3b7   :  { %v410_v0 = vpop.f32.mrf.mxu3 }
 0x3b9   :  { %v387_v5 = vpop.f32.mrf.mxu2 }
 0x3ba   :  { %455 = vrot.lane.b32.xlu1 %v410_v0, %s911_s16  ;;  %v830_v0 = vld [vmem:[%s1132_s6 + $0x2] ss:$0 sm:$0xff] }
 0x3be   :  { %v435_v1 = vpop.f32.mrf.mxu0 }
 0x3bf   :  { %466 = vrot.lane.b32.xlu0 %v435_v1, %s912_s17  ;;  %v412_v7 = vpop.f32.mrf.mxu3 }
 0x3c2   :  { %446 = vrot.lane.b32.xlu1 %v387_v5, %s910_s15 }
 0x3c6   :  { %v437_v6 = vpop.f32.mrf.mxu0 }
 0x3c7   :  { %468 = vrot.lane.b32.xlu2 %v437_v6, %s912_s17 }
 0x3ca   :  { %457 = vrot.lane.b32.xlu1 %v412_v7, %s911_s16  ;;  %v831_v7 = vld [vmem:[%s1132_s6 + $0x3] ss:$0 sm:$0xff] }
 0x3eb   :  { %v360_v8 = vpop.f32.mrf.mxu1 }
 0x3ec   :  { %440 = vst.msk [vmem:[#allocation3] sm:$0xff] %vm107_vm2, %v360_v8 }
 0x3f3   :  { %v362_v9 = vpop.f32.mrf.mxu1 }
 0x3f4   :  { %441 = vst.msk [vmem:[#allocation3 + $0x8] sm:$0xff] %vm107_vm2, %v362_v9  ;;  %vm647_vm2 = vcmask 523264  }
 0x421   :  { %v469_v17 = vpop.permute.xlu2 %468 }
 0x424   :  { %v445_v12 = vpop.permute.xlu1 %444 }
 0x425   :  { %451 = vst.msk [vmem:[#allocation3] sm:$0xff] %vm450_vm7, %v445_v12 }
 0x42c   :  { %v456_v13 = vpop.permute.xlu1 %455 }
 0x42d   :  { %462 = vst.msk [vmem:[#allocation3] sm:$0xff] %vm461_vm8, %v456_v13 }
 0x431   :  { %v467_v38 = vpop.permute.xlu0 %466 }
 0x432   :  { %473 = vst.msk [vmem:[#allocation3] sm:$0xff] %vm472_vm9, %v467_v38  ;;  %v800_v38 = vld [vmem:[%s1131_s5 + $0x18] sm:$0xff] }
 0x433   :  { %655 = vmatpush.bf16.msra.mxu3 %v800_v38 }
 0x434   :  { %v447_v25 = vpop.permute.xlu1 %446 }
 0x435   :  { %452 = vst.msk [vmem:[#allocation3 + $0x8] sm:$0xff] %vm450_vm7, %v447_v25  ;;  %v799_v25 = vld [vmem:[%s1131_s5 + $0x10] sm:$0xff] }
 0x437   :  { %656 = vmatpush.bf16.msra.mxu3 %v799_v25 }
 0x439   :  { %v475_v4 = vld [vmem:[#allocation3] sm:$0xff] }
 0x43c   :  { %v458_v43 = vpop.permute.xlu1 %457 }
 0x43d   :  { %463 = vst.msk [vmem:[#allocation3 + $0x8] sm:$0xff] %vm461_vm8, %v458_v43  ;;  %v798_v43 = vld [vmem:[%s1131_s5 + $0x8] sm:$0xff] }
 0x43e   :  { %474 = vst.msk [vmem:[#allocation3 + $0x8] sm:$0xff] %vm472_vm9, %v469_v17  ;;  %657 = vmatpush.bf16.msra.mxu3 %v798_v43  ;;  %v797_v17 = vld [vmem:[%s1131_s5] sm:$0xff] }
 0x442   :  { %658 = vmatpush.bf16.msra.mxu3 %v797_v17 }
 0x445   :  { %v476_v14 = vld [vmem:[#allocation3 + $0x8] sm:$0xff] }
 0x446   :  { %v477_v15 = vpack.c.bf16 %v476_v14, %v475_v4  ;;  %v832_v14 = vld [vmem:[%s1132_s6 + $0x4] ss:$0 sm:$0xff] }
 0x448   :  { %764 = vmatmul.msk.bf16.vlgmr.msra.gmra.mxu1 %vm49_vm0, %v477_v15 }
 0x4c5   :  { %v508_v18 = vpop.f32.mrf.mxu1 }
 0x4c6   :  { %v509_v19 = vadd.f32 %v829_v16, %v508_v18 }
 0x4c8   :  { %v513_v20 = vadd.f32 %v509_v19, %v965_v2 }
 0x4ca   :  { %v517_v21 = vsel %vm49_vm0, %v513_v20, 0.0 }
 0x4cb   :  { %518 = vadd.xlane.f32.xlu1 %v517_v21 }
 0x4cd   :  { %v510_v22 = vpop.f32.mrf.mxu1 }
 0x4ce   :  { %v511_v23 = vadd.f32 %v829_v16, %v510_v22  ;;  %v833_v22 = vld [vmem:[%s1132_s6 + $0x5] ss:$0 sm:$0xff] }
 0x4d0   :  { %v514_v24 = vadd.f32 %v511_v23, %v970_v3 }
 0x4d2   :  { %v520_v26 = vsel %vm49_vm0, %v514_v24, 0.0 }
 0x4d3   :  { %521 = vadd.xlane.f32.xlu0 %v520_v26 }
 0x53e   :  { %v519_v2 = vpop.xlane.xlu1 %518 }
 0x53f   :  { %v530_v34 = vmul.f32 %v1067_v33, %v519_v2 }
 0x541   :  { %v532_v35 = vsub.f32 %v513_v20, %v530_v34 }
 0x543   :  { %v534_v36 = vmul.f32 %v532_v35, %v532_v35 }
 0x545   :  { %v536_v3 = vsel %vm49_vm0, %v534_v36, 0.0 }
 0x546   :  { %v522_v37 = vpop.xlane.xlu0 %521  ;;  %537 = vadd.xlane.f32.xlu2 %v536_v3 }
 0x547   :  { %v531_v40 = vmul.f32 %v1067_v33, %v522_v37 }
 0x549   :  { %v533_v41 = vsub.f32 %v514_v24, %v531_v40 }
 0x54b   :  { %v535_v42 = vmul.f32 %v533_v41, %v533_v41 }
 0x54d   :  { %v539_v44 = vsel %vm49_vm0, %v535_v42, 0.0 }
 0x54e   :  { %540 = vadd.xlane.f32.xlu1 %v539_v44 }
 0x5b9   :  { %v538_v45 = vpop.xlane.xlu2 %537 }
 0x5ba   :  { %v542_v46 = vmul.f32 %v538_v45, %v1067_v33 }
 0x5bc   :  { %v544_v48 = vadd.f32 1e-05, %v542_v46 }
 0x5be   :  { %870 = vrsqrt.f32 %v544_v48  ;;  %vm552_vm12 = vweird.f32 %v544_v48 }
 0x5c1   :  { %v541_v49 = vpop.xlane.xlu1 %540 }
 0x5c2   :  { %v543_v50 = vmul.f32 %v541_v49, %v1067_v33 }
 0x5c4   :  { %v871_v51 = vpop.eup %870  ;;  %v545_v52 = vadd.f32 1e-05, %v543_v50 }
 0x5c5   :  { %v547_v53 = vmul.f32 %v871_v51, %v544_v48  ;;  %vm553_vm11 = vweird.f32 %v871_v51 }
 0x5c6   :  { %872 = vrsqrt.f32 %v545_v52  ;;  %vm554_vm13 = vmor %vm552_vm12, %vm553_vm11  ;;  %vm562_vm15 = vweird.f32 %v545_v52 }
 0x5c7   :  { %v548_v54 = vmul.f32 %v871_v51, %v547_v53 }
 0x5c9   :  { %v549_v56 = vmul.f32 0.5, %v548_v54 }
 0x5cb   :  { %v550_v57 = vsub.f32 1.5, %v549_v56 }
 0x5cc   :  { %v873_v58 = vpop.eup %872 }
 0x5cd   :  { %v551_v55 = vmul.f32 %v871_v51, %v550_v57  ;;  %v557_v59 = vmul.f32 %v873_v58, %v545_v52  ;;  %vm563_vm14 = vweird.f32 %v873_v58 }
 0x5ce   :  { %vm564_vm1 = vmor %vm562_vm15, %vm563_vm14 }
 0x5cf   :  { %v558_v60 = vmul.f32 %v873_v58, %v557_v59  ;;  %v555_v61 = vsel %vm554_vm13, %v871_v51, %v551_v55 }
 0x5d0   :  { %v566_v1 = vmul.f32 %v555_v61, %v532_v35 }
 0x5d1   :  { %v559_v62 = vmul.f32 0.5, %v558_v60  ;;  %v835_v60 = vld [vmem:[%s1132_s6 + $0x7] ss:$0 sm:$0xff] }
 0x5d2   :  { %v569_v8 = vmul.f32 %v830_v0, %v566_v1 }
 0x5d3   :  { %v560_v63 = vsub.f32 1.5, %v559_v62 }
 0x5d4   :  { %v572_v11 = vadd.f32 %v831_v7, %v569_v8 }
 0x5d5   :  { %v561_v5 = vmul.f32 %v873_v58, %v560_v63 }
 0x5d7   :  { %v565_v6 = vsel %vm564_vm1, %v873_v58, %v561_v5  ;;  %v834_v58 = vld [vmem:[%s1132_s6 + $0x6] ss:$0 sm:$0xff]  ;;  %s915_s6 = smov 128  }
 0x5d8   :  { %v567_v9 = vmul.f32 %v565_v6, %v533_v41 }
 0x5da   :  { %v570_v10 = vmul.f32 %v830_v0, %v567_v9 }
 0x5dc   :  { %v573_v12 = vadd.f32 %v831_v7, %v570_v10 }
 0x5de   :  { %v574_v13 = vpack.c.bf16 %v573_v12, %v572_v11 }
 0x5e0   :  { %773 = vmatmul.msk.bf16.vlgmr.msra.gmra.mxu2 %vm49_vm0, %v574_v13 }
 0x663   :  { %v605_v4 = vpop.f32.mrf.mxu2 }
 0x664   :  { %v606_v15 = vadd.f32 %v832_v14, %v605_v4 }
 0x666   :  { %v610_v19 = vmax.f32 %v606_v15, 0.0 }
 0x66b   :  { %v607_v16 = vpop.f32.mrf.mxu2 }
 0x66c   :  { %v608_v18 = vadd.f32 %v832_v14, %v607_v16 }
 0x66e   :  { %v611_v20 = vmax.f32 %v608_v18, 0.0 }
 0x670   :  { %v612_v21 = vpack.c.bf16 %v611_v20, %v610_v19 }
 0x672   :  { %790 = vmatmul.msk.bf16.vlgmr.msra.gmra.mxu3 %vm647_vm2, %v612_v21 }
 0x6f5   :  { %v660_v23 = vpop.f32.mrf.mxu3 }
 0x6f6   :  { %v661_v24 = vadd.f32 %v833_v22, %v660_v23 }
 0x6f8   :  { %v665_v26 = vadd.f32 %v661_v24, %v572_v11 }
 0x6fa   :  { %v669_v27 = vsel %vm49_vm0, %v665_v26, 0.0 }
 0x6fb   :  { %670 = vadd.xlane.f32.xlu1 %v669_v27 }
 0x6fd   :  { %v662_v28 = vpop.f32.mrf.mxu3 }
 0x6fe   :  { %v663_v29 = vadd.f32 %v833_v22, %v662_v28 }
 0x700   :  { %v666_v30 = vadd.f32 %v663_v29, %v573_v12 }
 0x702   :  { %v672_v31 = vsel %vm49_vm0, %v666_v30, 0.0 }
 0x703   :  { %673 = vadd.xlane.f32.xlu1 %v672_v31 }
 0x76e   :  { %v671_v32 = vpop.xlane.xlu1 %670 }
 0x76f   :  { %v675_v2 = vmul.f32 %v671_v32, %v1067_v33 }
 0x771   :  { %v677_v34 = vsub.f32 %v665_v26, %v675_v2 }
 0x773   :  { %v679_v35 = vmul.f32 %v677_v34, %v677_v34 }
 0x775   :  { %v681_v36 = vsel %vm49_vm0, %v679_v35, 0.0 }
 0x776   :  { %682 = vadd.xlane.f32.xlu0 %v681_v36  ;;  %v674_v3 = vpop.xlane.xlu1 %673 }
 0x777   :  { %v676_v37 = vmul.f32 %v674_v3, %v1067_v33 }
 0x779   :  { %v678_v40 = vsub.f32 %v666_v30, %v676_v37 }
 0x77b   :  { %v680_v41 = vmul.f32 %v678_v40, %v678_v40 }
 0x77d   :  { %v684_v42 = vsel %vm49_vm0, %v680_v41, 0.0 }
 0x77e   :  { %685 = vadd.xlane.f32.xlu2 %v684_v42 }
 0x7e9   :  { %v683_v44 = vpop.xlane.xlu0 %682 }
 0x7ea   :  { %v687_v39 = vmul.f32 %v683_v44, %v1067_v33 }
 0x7ec   :  { %v689_v45 = vadd.f32 1e-05, %v687_v39 }
 0x7ee   :  { %874 = vrsqrt.f32 %v689_v45  ;;  %vm697_vm4 = vweird.f32 %v689_v45 }
 0x7f1   :  { %v686_v46 = vpop.xlane.xlu2 %685 }
 0x7f2   :  { %v688_v47 = vmul.f32 %v686_v46, %v1067_v33 }
 0x7f4   :  { %v875_v48 = vpop.eup %874  ;;  %v690_v49 = vadd.f32 1e-05, %v688_v47 }
 0x7f5   :  { %v692_v50 = vmul.f32 %v875_v48, %v689_v45  ;;  %vm698_vm3 = vweird.f32 %v875_v48 }
 0x7f6   :  { %876 = vrsqrt.f32 %v690_v49  ;;  %vm699_vm5 = vmor %vm697_vm4, %vm698_vm3  ;;  %vm707_vm7 = vweird.f32 %v690_v49 }
 0x7f7   :  { %v693_v51 = vmul.f32 %v875_v48, %v692_v50 }
 0x7f9   :  { %v694_v52 = vmul.f32 0.5, %v693_v51 }
 0x7fb   :  { %v695_v53 = vsub.f32 1.5, %v694_v52 }
 0x7fc   :  { %v877_v54 = vpop.eup %876 }
 0x7fd   :  { %v696_v56 = vmul.f32 %v875_v48, %v695_v53  ;;  %v702_v57 = vmul.f32 %v877_v54, %v690_v49  ;;  %vm708_vm6 = vweird.f32 %v877_v54 }
 0x7fe   :  { %vm709_vm8 = vmor %vm707_vm7, %vm708_vm6 }
 0x7ff   :  { %v700_v55 = vsel %vm699_vm5, %v875_v48, %v696_v56  ;;  %v703_v59 = vmul.f32 %v877_v54, %v702_v57 }
 0x800   :  { %v711_v33 = vmul.f32 %v700_v55, %v677_v34 }
 0x801   :  { %v704_v61 = vmul.f32 0.5, %v703_v59 }
 0x802   :  { %v714_v62 = vmul.f32 %v834_v58, %v711_v33 }
 0x803   :  { %v705_v63 = vsub.f32 1.5, %v704_v61 }
 0x804   :  { %v717_v0 = vadd.f32 %v835_v60, %v714_v62 }
 0x805   :  { %v706_v1 = vmul.f32 %v877_v54, %v705_v63 }
 0x806   :  { %719 = vst.msk [vmem:[#allocation4] sm:$0xff] %vm49_vm0, %v717_v0 }
 0x807   :  { %v710_v5 = vsel %vm709_vm8, %v877_v54, %v706_v1 }
 0x808   :  { %v712_v6 = vmul.f32 %v710_v5, %v678_v40 }
 0x80a   :  { %v715_v7 = vmul.f32 %v834_v58, %v712_v6 }
 0x80c   :  { %v718_v8 = vadd.f32 %v835_v60, %v715_v7 }
 0x80e   :  { %720 = vst.msk [vmem:[#allocation4 + $0x8] sm:$0xff] %vm49_vm0, %v718_v8 }
 0x80f   :  { %733 = dma.vmem_to_hbm [thread:$0]  %s726_s21, 256, %s728_s23, [#allocation5], %s915_s6, %s915_s6, %s910_s15  }
 0x810   :  { %902 = dma.done.wait [#allocation5], 256  }
 0x811   :  { %903 = vsyncadd [#allocation5], 4294967040 }
 0x812   :  { %738 = vsyncpa [#allocation5], 1 }

</bundles_post_ra>
